<compile_context>
chip_gen: v7x
topology: tpu7x:2x2x1
jax: 0.10.0
libtpu: 0.0.40
codegen_flags: <defaults>
</compile_context>

<pallas_src>
import functools

import jax
import jax.numpy as jnp
from jax.experimental import pallas as pl
from jax.experimental.pallas import tpu as pltpu


def _label_smoothing_kernel(pred_ref, tgt_ref, out_ref, *,
                            smoothing, ignore_index, total_b, total_t):
    b = pl.program_id(0)
    j = pl.program_id(1)

    tb, C, tile_t = pred_ref.shape
    base = smoothing / (C - 1)
    w_true = 1.0 - smoothing

    tgt = tgt_ref[...]                                               # (tb, 1, tile_t) i32
    cls = jax.lax.broadcasted_iota(jnp.int32, (tb, C, tile_t), 1)    # class ids (sublanes)
    is_tgt = cls == tgt                                              # (tb, C, tile_t)

    # Fused weighted class reduction: weight = 1-smoothing at target class, else base.
    if pred_ref.dtype == jnp.dtype(jnp.bfloat16):
        w = jnp.where(is_tgt, jnp.bfloat16(w_true), jnp.bfloat16(base))
        weighted = (pred_ref[...] * w).astype(jnp.float32)
    else:
        w = jnp.where(is_tgt, jnp.float32(w_true), jnp.float32(base))
        weighted = pred_ref[...].astype(jnp.float32) * w
    per_col = jnp.sum(weighted, axis=1, keepdims=True)               # (tb, 1, tile_t) f32

    # Validity mask (select-based, so OOB garbage never reaches the sum).
    valid = tgt != ignore_index
    if total_t % tile_t != 0:   # ragged last T tile
        col = jax.lax.broadcasted_iota(jnp.int32, (tb, 1, tile_t), 2) + j * tile_t
        valid = valid & (col < total_t)
    if total_b % tb != 0:       # ragged last batch block
        row = jax.lax.broadcasted_iota(jnp.int32, (tb, 1, tile_t), 0) + b * tb
        valid = valid & (row < total_b)

    partial = -jnp.sum(jnp.where(valid, per_col, 0.0))

    # Output block is resident across the (innermost, arbitrary) j axis: accumulate.
    @pl.when(j == 0)
    def _():
        out_ref[...] = jnp.zeros_like(out_ref)

    out_ref[...] += partial


def label_smoothing_loss(pred, target, *, smoothing=0.1, ignore_index=-100,
                         tile_t=None, tile_b=None):
    """pred: [B, C, T] log-probs, target: [B, T] int labels -> scalar loss (sum over valid)."""
    B, C, T = pred.shape
    # Tiny reshape of target only; pred is consumed in its native [B, C, T] layout.
    tgt = target.reshape(B, 1, T).astype(jnp.int32)

    itemsize = jnp.dtype(pred.dtype).itemsize
    budget = 4 * 1024 * 1024            # target bytes of pred per pipeline buffer

    if tile_t is None:
        tile_t = max(128, (budget // max(C * itemsize, 1)) // 128 * 128)
    else:
        tile_t = max(128, ((int(tile_t) + 127) // 128) * 128)   # keep lanes 128-aligned
    if tile_t >= T:
        tile_t = T                       # block == full array extent is always legal
    n_t = pl.cdiv(T, tile_t)

    # Pack multiple batch rows per grid step when one row's slab is small.
    row_bytes = C * tile_t * itemsize
    if tile_b is None:
        tb = int(max(1, min(B, budget // max(row_bytes, 1))))
    else:
        tb = int(max(1, min(B, int(tile_b))))
    n_b = pl.cdiv(B, tb)

    # VMEM budget: double-buffered pred + target blocks, one full-tile f32 temp, slack.
    block_bytes = tb * C * tile_t * itemsize
    needed = 2 * block_bytes + 2 * tb * tile_t * 4 + tb * C * tile_t * 4 + (2 << 20)
    vmem_limit = int(min(48 << 20, max(32 << 20, needed)))   # <= 48 MiB: v7x headroom

    kernel = functools.partial(
        _label_smoothing_kernel,
        smoothing=float(smoothing), ignore_index=int(ignore_index),
        total_b=B, total_t=T)

    partials = pl.pallas_call(
        kernel,
        out_shape=jax.ShapeDtypeStruct((n_b, 1, 1), jnp.float32),
        grid_spec=pltpu.PrefetchScalarGridSpec(
            num_scalar_prefetch=0,
            grid=(n_b, n_t),
            in_specs=[
                pl.BlockSpec((tb, C, tile_t), lambda b, j: (b, 0, j)),
                pl.BlockSpec((tb, 1, tile_t), lambda b, j: (b, 0, j)),
            ],
            out_specs=pl.BlockSpec((1, 1, 1), lambda b, j: (b, 0, 0)),
        ),
        compiler_params=pltpu.CompilerParams(
            dimension_semantics=("parallel", "arbitrary"),
            vmem_limit_bytes=vmem_limit),
    )(pred, tgt)
    return jnp.sum(partials)   # tiny (n_b,) reduction


def _reference_loss(pred, target, *, smoothing=0.1, ignore_index=-100):
    """Pure-JAX reference mirroring the PyTorch module."""
    B, C, T = pred.shape
    p = jnp.transpose(pred, (0, 2, 1)).reshape(-1, C).astype(jnp.float32)
    t = target.reshape(-1)
    base = smoothing / (C - 1)
    mask = t != ignore_index
    safe_t = jnp.where(mask, t, 0)
    cls = jax.lax.broadcasted_iota(jnp.int32, p.shape, 1)
    true_dist = jnp.where((cls == safe_t[:, None]) & mask[:, None], 1.0 - smoothing, base)
    row_loss = jnp.sum(-true_dist * p, axis=1)
    return jnp.sum(jnp.where(mask, row_loss, 0.0))


if __name__ == "__main__":
    smoothing, ignore_index = 0.1, -100

    # Check 1: small shape matching the module's forward (whole T resident in one block).
    B, C, T = 2, 8, 16
    k1, k2, k3 = jax.random.split(jax.random.PRNGKey(0), 3)
    logits = jax.random.normal(k1, (B, C, T), dtype=jnp.float32)
    pred = jax.nn.log_softmax(logits, axis=1)
    target = jax.random.randint(k2, (B, T), 0, C, dtype=jnp.int32)
    target = jnp.where(jax.random.bernoulli(k3, 0.25, (B, T)), ignore_index, target)

    loss = label_smoothing_loss(pred, target, smoothing=smoothing, ignore_index=ignore_index)
    loss = jax.block_until_ready(loss)
    ref = _reference_loss(pred, target, smoothing=smoothing, ignore_index=ignore_index)
    assert jnp.allclose(loss, ref, rtol=5e-5, atol=1e-3), (loss, ref)

    # Check 2: ragged T (200 with 128-lane tiles) + ragged batch block (B=3, tile_b=2)
    # + non-128-multiple user tile_t (rounded up) to exercise all masking paths.
    B2, C2, T2 = 3, 8, 200
    k4, k5, k6 = jax.random.split(jax.random.PRNGKey(1), 3)
    logits2 = jax.random.normal(k4, (B2, C2, T2), dtype=jnp.float32)
    pred2 = jax.nn.log_softmax(logits2, axis=1)
    target2 = jax.random.randint(k5, (B2, T2), 0, C2, dtype=jnp.int32)
    target2 = jnp.where(jax.random.bernoulli(k6, 0.25, (B2, T2)), ignore_index, target2)

    loss2 = label_smoothing_loss(pred2, target2, smoothing=smoothing,
                                 ignore_index=ignore_index, tile_t=100, tile_b=2)
    loss2 = jax.block_until_ready(loss2)
    ref2 = _reference_loss(pred2, target2, smoothing=smoothing, ignore_index=ignore_index)
    assert jnp.allclose(loss2, ref2, rtol=5e-5, atol=1e-3), (loss2, ref2)

    # Check 3: bf16 smoke test for the low-precision compute path (loose tolerance:
    # only the in-tile bf16 multiply differs from the f32 reference on the same inputs).
    pred3 = pred2.astype(jnp.bfloat16)
    loss3 = label_smoothing_loss(pred3, target2, smoothing=smoothing,
                                 ignore_index=ignore_index, tile_t=128)
    loss3 = jax.block_until_ready(loss3)
    ref3 = _reference_loss(pred3, target2, smoothing=smoothing, ignore_index=ignore_index)
    assert jnp.isfinite(loss3) and jnp.allclose(loss3, ref3, rtol=2e-2, atol=1.0), (loss3, ref3)

    print("KERNEL_OK")
</pallas_src>

<mosaic_0001>
module attributes {stable_mosaic.version = 11 : i64} {
  func.func @_label_smoothing_kernel(%arg0: i32, %arg1: i32, %arg2: memref<2x8x16xf32, #tpu.memory_space<vmem>>, %arg3: memref<2x1x16xi32, #tpu.memory_space<vmem>>, %arg4: memref<1x1x1xf32, #tpu.memory_space<vmem>>) attributes {dimension_semantics = [#tpu.dimension_semantics<parallel>, #tpu.dimension_semantics<arbitrary>], iteration_bounds = array<i64: 1, 1>, scalar_prefetch = 0 : i64, scratch_operands = 0 : i64, tpu.core_type = #tpu.core_type<tc>, window_params = [{transform_indices = @transform_0, window_bounds = array<i64: 2, 8, 16>}, {transform_indices = @transform_1, window_bounds = array<i64: 2, 1, 16>}, {transform_indices = @transform_2, window_bounds = array<i64: 1, 1, 1>}]} {
    %c0 = arith.constant 0 : index
    %c0_0 = arith.constant 0 : index
    %c0_1 = arith.constant 0 : index
    %0 = vector.load %arg3[%c0, %c0_0, %c0_1] : memref<2x1x16xi32, #tpu.memory_space<vmem>>, vector<2x1x16xi32>
    %1 = tpu.iota {dimensions = array<i32: 1>} : vector<2x8x16xi32>
    %2 = vector.broadcast %0 : vector<2x1x16xi32> to vector<2x8x16xi32>
    %3 = arith.cmpi eq, %1, %2 : vector<2x8x16xi32>
    %cst = arith.constant 0.899999976 : f32
    %cst_2 = arith.constant 0.0142857144 : f32
    %4 = vector.broadcast %cst : f32 to vector<2x8x16xf32>
    %5 = vector.broadcast %cst_2 : f32 to vector<2x8x16xf32>
    %6 = arith.select %3, %4, %5 : vector<2x8x16xi1>, vector<2x8x16xf32>
    %c0_3 = arith.constant 0 : index
    %c0_4 = arith.constant 0 : index
    %c0_5 = arith.constant 0 : index
    %7 = vector.load %arg2[%c0_3, %c0_4, %c0_5] : memref<2x8x16xf32, #tpu.memory_space<vmem>>, vector<2x8x16xf32>
    %8 = arith.mulf %7, %6 : vector<2x8x16xf32>
    %cst_6 = arith.constant dense<0.000000e+00> : vector<2x16xf32>
    %9 = vector.multi_reduction <add>, %8, %cst_6 [1] : vector<2x8x16xf32> to vector<2x16xf32>
    %10 = vector.shape_cast %9 : vector<2x16xf32> to vector<2x1x16xf32>
    %c-100_i32 = arith.constant -100 : i32
    %11 = vector.broadcast %c-100_i32 : i32 to vector<2x1x16xi32>
    %12 = arith.cmpi ne, %0, %11 : vector<2x1x16xi32>
    %cst_7 = arith.constant 0.000000e+00 : f32
    %13 = vector.broadcast %cst_7 : f32 to vector<2x1x16xf32>
    %14 = arith.select %12, %10, %13 : vector<2x1x16xi1>, vector<2x1x16xf32>
    %15 = vector.shape_cast %14 : vector<2x1x16xf32> to vector<1x2x1x16xf32>
    %cst_8 = arith.constant dense<0.000000e+00> : vector<1xf32>
    %16 = vector.multi_reduction <add>, %15, %cst_8 [1, 2, 3] : vector<1x2x1x16xf32> to vector<1xf32>
    %17 = vector.shape_cast %16 : vector<1xf32> to vector<1x1x1x1xf32>
    %18 = vector.extract %17[0, 0, 0, 0] : f32 from vector<1x1x1x1xf32>
    %cst_9 = arith.constant 0.000000e+00 : f32
    %19 = arith.subf %cst_9, %18 : f32
    %c0_i32 = arith.constant 0 : i32
    %20 = arith.cmpi eq, %arg1, %c0_i32 : i32
    %21 = arith.extui %20 : i1 to i32
    %c0_i32_10 = arith.constant 0 : i32
    %22 = arith.cmpi ne, %21, %c0_i32_10 : i32
    scf.if %22 {
      %cst_17 = arith.constant 0.000000e+00 : f32
      %27 = vector.broadcast %cst_17 : f32 to vector<1x1x1xf32>
      %c0_18 = arith.constant 0 : index
      %c0_19 = arith.constant 0 : index
      %c0_20 = arith.constant 0 : index
      %28 = vector.load %arg4[%c0_18, %c0_19, %c0_20] : memref<1x1x1xf32, #tpu.memory_space<vmem>>, vector<1x1x1xf32>
      tpu.vector_store %arg4[%c0_18, %c0_19, %c0_20], %27 {strides = array<i32>} : memref<1x1x1xf32, #tpu.memory_space<vmem>>, vector<1x1x1xf32>,
    } else {
    }
    %c0_11 = arith.constant 0 : index
    %c0_12 = arith.constant 0 : index
    %c0_13 = arith.constant 0 : index
    %23 = vector.load %arg4[%c0_11, %c0_12, %c0_13] : memref<1x1x1xf32, #tpu.memory_space<vmem>>, vector<1x1x1xf32>
    %24 = vector.broadcast %19 : f32 to vector<1x1x1xf32>
    %25 = arith.addf %23, %24 : vector<1x1x1xf32>
    %c0_14 = arith.constant 0 : index
    %c0_15 = arith.constant 0 : index
    %c0_16 = arith.constant 0 : index
    %26 = vector.load %arg4[%c0_14, %c0_15, %c0_16] : memref<1x1x1xf32, #tpu.memory_space<vmem>>, vector<1x1x1xf32>
    tpu.vector_store %arg4[%c0_14, %c0_15, %c0_16], %25 {strides = array<i32>} : memref<1x1x1xf32, #tpu.memory_space<vmem>>, vector<1x1x1xf32>,
    return
  }
  func.func @transform_0(%arg0: i32, %arg1: i32) -> (i32, i32, i32) {
    %c0_i32 = arith.constant 0 : i32
    %c0_i32_0 = arith.constant 0 : i32
    return %arg0, %c0_i32, %arg1 : i32, i32, i32
  }
  func.func @transform_1(%arg0: i32, %arg1: i32) -> (i32, i32, i32) {
    %c0_i32 = arith.constant 0 : i32
    %c0_i32_0 = arith.constant 0 : i32
    return %arg0, %c0_i32, %arg1 : i32, i32, i32
  }
  func.func @transform_2(%arg0: i32, %arg1: i32) -> (i32, i32, i32) {
    %c0_i32 = arith.constant 0 : i32
    %c0_i32_0 = arith.constant 0 : i32
    %c0_i32_1 = arith.constant 0 : i32
    return %arg0, %c0_i32, %c0_i32_0 : i32, i32, i32
  }
}

</mosaic_0001>

<bundles_post_ra>
// kernel: tpu_custom_call.1
= control target key start
LH: loop header
LB: loop body
LE: loop exit
PB: predicated region body
PF: predicated region fallthrough
CT: control target
= control target key end

     0   :  { %7 = vsyncpa [#allocation3], 0  ;;  %s214_s0 = inlined_call_operand.hbm [shape: f32[2,8,16], index: 0, kind: input, shape index: {}]   ;;  %s215_s1 = inlined_call_operand.vmem [shape: s32[2,1,16], index: 1, kind: input, shape index: {}]   ;;  %s216_s2 = inlined_call_operand.hbm [shape: f32[1,1,1], index: 2, kind: output, shape index: {}]  }
   0x1   :  { %8 = vsyncpa [#allocation4], 0  ;;  %s161_s9 = smov [#allocation2]   ;;  %s113_s13 = scalar_lea.hbm %s214_s0, 256 }
   0x2   :  { %s14_s10 = sshll.u32 %s161_s9, 4  ;;  %p114_p0 = scmp.ne.s32.totalorder %s214_s0, %s113_s13  ;;  %s15_s10 = int_to_ptr.vmem [resolvable:$true] %s14_s10 }
   0x3   :  { %p117_p1 = scmp.lt.u32.totalorder %s113_s13, %s214_s0 }
   0x5   :  { %p119_p2 = pnand %p117_p1, %p114_p0 }
   0x7   :  { %122 = shalt.err (!%p119_p2)
}
   0x8   :  { %s123_s18 = scalar_lea.vmem %s15_s10, 256  ;;  %p128_p4 = scmp.lt.s32.totalorder %s15_s10, %s15_s10 }
   0x9   :  { %p124_p3 = scmp.ne.s32.totalorder %s15_s10, %s123_s18  ;;  %p129_p5 = scmp.lt.s32.totalorder %s123_s18, %s123_s18 }
   0xb   :  { %p130_p6 = por %p129_p5, %p128_p4 }
   0xd   :  { %p131_p7 = pnand %p130_p6, %p124_p3 }
   0xf   :  { %134 = shalt.err (!%p131_p7)
}
  0x10   :  { %s162_s19 = smov 128   ;;  %s163_s20 = smov 8  }
  0x11   :  { %20 = dma.hbm_to_vmem [thread:$0]  %s214_s0, 256, %s15_s10, [#allocation3], %s162_s19, %s162_s19, %s163_s20  }
  0x12   :  { %157 = dma.done.wait [#allocation3], 256  }
  0x13   :  { %158 = vsyncadd [#allocation3], 4294967040  ;;  %vm83_vm0 = vcmask 0   ;;  %v28_v0 = vlaneseq  ;;  %v164_v1 = vmov 0.0   ;;  %v26_v4 = vld [vmem:[%s215_s1] sm:$0x1] }
  0x14   :  { %84 = vst.msk [vmem:[#allocation5] sm:$0x1] %vm83_vm0, %v164_v1  ;;  %v27_v5 = vld [vmem:[%s215_s1 + $0x1] sm:$0x1]  ;;  %v43_v9 = vld [vmem:[#allocation2 + $0x8] sm:$0xff]  ;;  %vm46_vm3 = vcmask 130048  }
  0x15   :  { %v29_v2 = vshrl.u32 %v28_v0, 7  ;;  %v42_v8 = vld [vmem:[#allocation2] sm:$0xff]  ;;  %v165_v10 = vmov 0.014285714   ;;  %vm61_vm4 = vcmp.ne.s32.totalorder %v26_v4, 4294967196  ;;  %vm62_vm5 = vcmp.ne.s32.totalorder %v27_v5, 4294967196 }
  0x16   :  { %vm65_vm6 = vcmask 122880   ;;  %s166_s27 = smov [#allocation5]  }
  0x17   :  { %v32_v3 = vsub.s32 0, %v29_v2  ;;  %s96_s28 = sshll.u32 %s166_s27, 4  ;;  %s97_s28 = int_to_ptr.vmem [resolvable:$true] %s96_s28 }
  0x18   :  { %s135_s29 = scalar_lea.vmem %s97_s28, 16  ;;  %s139_s30 = scalar_lea.vmem %s97_s28, 32 }
  0x19   :  { %v33_v6 = vrot.slane %v26_v4, %v32_v3  ;;  %v37_v7 = vrot.slane %v27_v5, %v32_v3  ;;  %p136_p8 = scmp.ne.s32.totalorder %s97_s28, %s135_s29  ;;  %p140_p9 = scmp.lt.s32.totalorder %s97_s28, %s97_s28 }
  0x1a   :  { %p141_p10 = scmp.lt.s32.totalorder %s139_s30, %s135_s29 }
  0x1b   :  { %vm38_vm1 = vcmp.eq.s32.totalorder %v29_v2, %v33_v6  ;;  %vm39_vm2 = vcmp.eq.s32.totalorder %v29_v2, %v37_v7  ;;  %v85_v41 = vld [vmem:[#allocation5] sm:$0x1] }
  0x1c   :  { %v40_v11 = vsel %vm38_vm1, 0.9, %v165_v10  ;;  %v41_v12 = vsel %vm39_vm2, 0.9, %v165_v10  ;;  %p142_p11 = por %p141_p10, %p140_p9 }
  0x1d   :  { %v44_v13 = vmul.f32 %v42_v8, %v40_v11  ;;  %v45_v14 = vmul.f32 %v43_v9, %v41_v12 }
  0x1e   :  { %p143_p12 = pnand %p142_p11, %p136_p8 }
  0x1f   :  { %v47_v15 = vsel %vm46_vm3, %v44_v13, 0.0  ;;  %v54_v16 = vsel %vm46_vm3, %v45_v14, 0.0 }
  0x20   :  { %v48_v17 = vrot.slane %v47_v15, 4  ;;  %v55_v18 = vrot.slane %v54_v16, 4 }
  0x22   :  { %v49_v19 = vadd.f32 %v48_v17, %v47_v15  ;;  %v56_v20 = vadd.f32 %v55_v18, %v54_v16 }
  0x24   :  { %v50_v21 = vrot.slane %v49_v19, 2  ;;  %v57_v22 = vrot.slane %v56_v20, 2 }
  0x26   :  { %v51_v23 = vadd.f32 %v50_v21, %v49_v19  ;;  %v58_v24 = vadd.f32 %v57_v22, %v56_v20 }
  0x28   :  { %v52_v25 = vrot.slane %v51_v23, 1  ;;  %v59_v26 = vrot.slane %v58_v24, 1 }
  0x2a   :  { %v53_v27 = vadd.f32 %v52_v25, %v51_v23  ;;  %v60_v28 = vadd.f32 %v59_v26, %v58_v24 }
  0x2c   :  { %v63_v29 = vsel %vm61_vm4, %v53_v27, 0.0  ;;  %v64_v30 = vsel %vm62_vm5, %v60_v28, 0.0 }
  0x2d   :  { %v66_v31 = vsel %vm65_vm6, %v63_v29, 0.0  ;;  %v67_v32 = vsel %vm65_vm6, %v64_v30, 0.0 }
  0x2e   :  { %v68_v33 = vadd.f32 %v67_v32, %v66_v31 }
  0x30   :  { %69 = vadd.xlane.f32.xlu0 %v68_v33 }
  0xbd   :  { %v70_v34 = vpop.xlane.xlu0 %69 }
  0xbe   :  { %v71_v35 = vrot.slane %v70_v34, 4 }
  0xc0   :  { %v72_v36 = vadd.f32 %v71_v35, %v70_v34 }
  0xc2   :  { %v73_v37 = vrot.slane %v72_v36, 2 }
  0xc4   :  { %v74_v38 = vadd.f32 %v73_v37, %v72_v36 }
  0xc6   :  { %v75_v39 = vrot.slane %v74_v38, 1 }
  0xc8   :  { %v76_v40 = vadd.f32 %v75_v39, %v74_v38 }
  0xca   :  { %105 = vpush %v76_v40 }
  0xfb   :  { %s106_s0 = spop %105 }
  0xfc   :  { %s78_s1 = ssub.f32 0.0, %s106_s0 }
  0xfe   :  { %v86_v42 = vstv %s78_s1 }
  0xff   :  { %v87_v43 = vadd.f32 %v86_v42, %v85_v41 }
 0x101   :  { %89 = vst.msk [vmem:[#allocation5] sm:$0x1] %vm83_vm0, %v87_v43 }
 0x102   :  { %146 = shalt.err (!%p143_p12)
}
 0x103   :  { %s147_s5 = scalar_lea.hbm %s216_s2, 16 }
 0x104   :  { %p148_p13 = scmp.ne.s32.totalorder %s216_s2, %s147_s5  ;;  %p151_p0 = scmp.lt.u32.totalorder %s147_s5, %s216_s2 }
 0x106   :  { %p153_p1 = pnand %p151_p0, %p148_p13 }
 0x108   :  { %156 = shalt.err (!%p153_p1)
}
 0x109   :  { %99 = dma.vmem_to_hbm [thread:$0]  %s97_s28, 16, %s216_s2, [#allocation4]  }
 0x10a   :  { %159 = dma.done.wait [#allocation4], 16  }
 0x10b   :  { %160 = vsyncadd [#allocation4], 4294967280 }
 0x10c   :  { %103 = vsyncpa [#allocation3], 1 }
 0x10d   :  { %104 = vsyncpa [#allocation4], 1 }

</bundles_post_ra>
